<compile_context>
chip_gen: v5e
topology: v5e:2x2
jax: 0.10.0
libtpu: 0.0.40
codegen_flags: <defaults>
</compile_context>

<pallas_src>
import functools

import jax
import jax.numpy as jnp
from jax.experimental import pallas as pl
from jax.experimental.pallas import tpu as pltpu

MIN_NORM = 1e-15
EPS = 1e-7


def _hypact_kernel(x_ref, o_ref, *, sqrt_k_in, sqrt_k_out):
    # x_ref / o_ref: (D, tile_n) -- features on sublanes, points on lanes.
    inv_sqrt_k_in = 1.0 / sqrt_k_in
    inv_sqrt_k_out = 1.0 / sqrt_k_out

    x = x_ref[...].astype(jnp.float32)                   # (D, tile_n), single load
    x_time = x[0:1, :]                                    # (1, tile_n), from loaded block

    d_amb = x.shape[0]
    row = jax.lax.broadcasted_iota(jnp.int32, (d_amb, 1), 0)
    is_spatial = row > 0                                   # (D, 1) mask, broadcasts free

    # --- logmap0 on manifold_in (Lorentz / Hyperboloid, curvature c_in) ---
    spatial = jnp.where(is_spatial, x, 0.0)                # time row zeroed
    sp_sq = jnp.sum(spatial * spatial, axis=0, keepdims=True)          # (1, tile_n)
    inv_sp_norm = jax.lax.rsqrt(jnp.maximum(sp_sq, MIN_NORM * MIN_NORM))
    theta = jnp.maximum(x_time * inv_sqrt_k_in, 1.0 + EPS)
    # arcosh(theta) via (theta-1)*(theta+1): no theta^2-1 cancellation near 1.
    arcosh = jnp.log(theta + jnp.sqrt((theta - 1.0) * (theta + 1.0)))
    f = (sqrt_k_in * arcosh) * inv_sp_norm                 # (1, tile_n), f >= 0

    # --- activation (ReLU), folded through the nonnegative scale f ---
    # ReLU(f * spatial) == f * ReLU(spatial) because f >= 0 by construction.
    relu_sp = jnp.maximum(spatial, 0.0)                    # (D, tile_n), time row stays 0
    r_sq = jnp.sum(relu_sp * relu_sp, axis=0, keepdims=True)           # (1, tile_n)
    inv_r_norm = jax.lax.rsqrt(jnp.maximum(r_sq, MIN_NORM * MIN_NORM))
    r_norm = r_sq * inv_r_norm                             # == sqrt(r_sq)
    # proj_tan0 is a no-op: the time component of the tangent vector is exactly 0.

    # --- expmap0 on manifold_out (curvature c_out) ---
    # ||u|| = f * r_norm ;  u / ||u|| = relu_sp / r_norm  (independent of f).
    th = (f * r_norm) * inv_sqrt_k_out
    e_pos = jnp.exp(th)
    e_neg = jnp.exp(-th)
    cosh_th = 0.5 * (e_pos + e_neg)
    sinh_th = 0.5 * (e_pos - e_neg)
    y_time = sqrt_k_out * cosh_th                          # (1, tile_n)
    g = (sqrt_k_out * sinh_th) * inv_r_norm                # (1, tile_n) spatial scale

    # Two stores instead of a (D, tile_n) select: y_sp row 0 is exactly 0, then
    # the time row is overwritten.
    o_ref[...] = (g * relu_sp).astype(o_ref.dtype)
    o_ref[0:1, :] = y_time.astype(o_ref.dtype)


def hyp_act_dn(xt, c_in=1.0, c_out=2.0, tile_n=16384):
    """HypAct forward in lane-dense layout. xt: (D, N) Lorentz points (D = 1 + d),
    points on the trailing axis. Returns (D, N). No wrapper transposes."""
    d_amb, n = xt.shape
    sqrt_k_in = float((1.0 / c_in) ** 0.5)
    sqrt_k_out = float((1.0 / c_out) ** 0.5)

    lane = 128
    n_lane = pl.cdiv(n, lane) * lane
    tile = min(tile_n, n_lane)
    # Keep >=2 grid steps whenever possible so the "parallel" grid axis can shard
    # across v7x's 2 TensorCores (costs nothing on single-TC v5e/v6e).
    if n_lane > lane and n_lane // tile < 2:
        tile = max(lane, pl.cdiv(n_lane // 2, lane) * lane)
    n_pad = pl.cdiv(n_lane, tile) * tile
    if n_pad != n:
        # Zero padding is numerically safe through the kernel (clamps keep it
        # finite); padded columns are sliced off below.
        xt = jnp.pad(xt, ((0, 0), (0, n_pad - n)))

    kernel = functools.partial(
        _hypact_kernel, sqrt_k_in=sqrt_k_in, sqrt_k_out=sqrt_k_out
    )
    yt = pl.pallas_call(
        kernel,
        out_shape=jax.ShapeDtypeStruct((d_amb, n_pad), xt.dtype),
        grid_spec=pltpu.PrefetchScalarGridSpec(
            num_scalar_prefetch=0,
            grid=(n_pad // tile,),
            in_specs=[pl.BlockSpec((d_amb, tile), lambda i: (0, i))],
            out_specs=pl.BlockSpec((d_amb, tile), lambda i: (0, i)),
        ),
        compiler_params=pltpu.CompilerParams(
            dimension_semantics=("parallel",),
            vmem_limit_bytes=48 * 1024 * 1024,
        ),
    )(xt)
    if n_pad != n:
        yt = yt[:, :n]
    return yt


def hyp_act(x, c_in=1.0, c_out=2.0, tile_n=16384):
    """Module-parity API: x (N, D) -> (N, D). Pays one XLA transpose each way;
    prefer hyp_act_dn with a (D, N) producer/consumer for minimal HBM traffic."""
    return hyp_act_dn(x.T, c_in=c_in, c_out=c_out, tile_n=tile_n).T


def _hyp_act_ref(x, c_in=1.0, c_out=2.0):
    """Pure-JAX reference for verification (HGCN Hyperboloid formulas)."""
    sqrt_k_in = (1.0 / c_in) ** 0.5
    sqrt_k_out = (1.0 / c_out) ** 0.5
    sp = x[:, 1:]
    sp_norm = jnp.maximum(jnp.linalg.norm(sp, axis=-1, keepdims=True), MIN_NORM)
    theta = jnp.maximum(x[:, 0:1] / sqrt_k_in, 1.0 + EPS)
    u_sp = sqrt_k_in * jnp.arccosh(theta) * sp / sp_norm
    u_sp = jnp.maximum(u_sp, 0.0)  # ReLU; time coord already 0
    u_norm = jnp.maximum(jnp.linalg.norm(u_sp, axis=-1, keepdims=True), MIN_NORM)
    th = u_norm / sqrt_k_out
    y_time = sqrt_k_out * jnp.cosh(th)
    y_sp = sqrt_k_out * jnp.sinh(th) * u_sp / u_norm
    return jnp.concatenate([y_time, y_sp], axis=-1)


if __name__ == "__main__":
    key = jax.random.PRNGKey(0)
    N, d = 300, 16          # N points, d spatial features, ambient D = d + 1
    c_in, c_out = 1.0, 2.0  # fixed curvatures of manifold_in / manifold_out

    # Valid Lorentz points for curvature c_in: x0 = sqrt(K + ||x_sp||^2), K = 1/c_in.
    sp = 0.5 * jax.random.normal(key, (N, d), dtype=jnp.float32)
    k_in = 1.0 / c_in
    x0 = jnp.sqrt(k_in + jnp.sum(sp * sp, axis=-1, keepdims=True))
    x = jnp.concatenate([x0, sp], axis=-1)  # (N, D) with D = 17

    y_ref = _hyp_act_ref(x, c_in=c_in, c_out=c_out)

    # Module-parity (N, D) path.
    y = jax.block_until_ready(hyp_act(x, c_in=c_in, c_out=c_out))
    assert y.shape == x.shape
    assert jnp.allclose(y, y_ref, atol=1e-5, rtol=1e-5), "mismatch vs reference (N,D)"

    # Lane-dense (D, N) path (preferred; no wrapper transposes).
    yt = jax.block_until_ready(hyp_act_dn(x.T, c_in=c_in, c_out=c_out))
    assert yt.shape == (x.shape[1], x.shape[0])
    assert jnp.allclose(yt.T, y_ref, atol=1e-5, rtol=1e-5), "mismatch vs reference (D,N)"

    print("KERNEL_OK")
</pallas_src>

<mosaic_0001>
module attributes {stable_mosaic.version = 11 : i64} {
  func.func @_hypact_kernel(%arg0: i32, %arg1: memref<17x256xf32, #tpu.memory_space<vmem>>, %arg2: memref<17x256xf32, #tpu.memory_space<vmem>>) attributes {dimension_semantics = [#tpu.dimension_semantics<parallel>], iteration_bounds = array<i64: 2>, scalar_prefetch = 0 : i64, scratch_operands = 0 : i64, tpu.core_type = #tpu.core_type<tc>, window_params = [{transform_indices = @transform_0, window_bounds = array<i64: 17, 256>}, {transform_indices = @transform_1, window_bounds = array<i64: 17, 256>}]} {
    %c0 = arith.constant 0 : index
    %c0_0 = arith.constant 0 : index
    %0 = vector.load %arg1[%c0, %c0_0] : memref<17x256xf32, #tpu.memory_space<vmem>>, vector<17x256xf32>
    %1 = vector.extract_strided_slice %0 {offsets = [0, 0], sizes = [1, 256], strides = [1, 1]} : vector<17x256xf32> to vector<1x256xf32>
    %2 = tpu.iota {dimensions = array<i32: 0>} : vector<17x1xi32>
    %c0_i32 = arith.constant 0 : i32
    %3 = vector.broadcast %c0_i32 : i32 to vector<17x1xi32>
    %4 = arith.cmpi sgt, %2, %3 : vector<17x1xi32>
    %cst = arith.constant 0.000000e+00 : f32
    %5 = vector.shape_cast %4 : vector<17x1xi1> to vector<17x1xi1>
    %6 = vector.broadcast %5 : vector<17x1xi1> to vector<17x256xi1>
    %7 = vector.broadcast %cst : f32 to vector<17x256xf32>
    %8 = arith.select %6, %0, %7 : vector<17x256xi1>, vector<17x256xf32>
    %9 = arith.mulf %8, %8 : vector<17x256xf32>
    %cst_1 = arith.constant dense<0.000000e+00> : vector<256xf32>
    %10 = vector.multi_reduction <add>, %9, %cst_1 [0] : vector<17x256xf32> to vector<256xf32>
    %11 = vector.shape_cast %10 : vector<256xf32> to vector<1x256xf32>
    %cst_2 = arith.constant 1.000000e-30 : f32
    %12 = vector.broadcast %cst_2 : f32 to vector<1x256xf32>
    %13 = arith.maximumf %11, %12 : vector<1x256xf32>
    %14 = math.rsqrt %13 : vector<1x256xf32>
    %cst_3 = arith.constant 1.000000e+00 : f32
    %15 = vector.broadcast %cst_3 : f32 to vector<1x256xf32>
    %16 = arith.mulf %1, %15 : vector<1x256xf32>
    %cst_4 = arith.constant 1.00000012 : f32
    %17 = vector.broadcast %cst_4 : f32 to vector<1x256xf32>
    %18 = arith.maximumf %16, %17 : vector<1x256xf32>
    %cst_5 = arith.constant 1.000000e+00 : f32
    %19 = vector.broadcast %cst_5 : f32 to vector<1x256xf32>
    %20 = arith.subf %18, %19 : vector<1x256xf32>
    %cst_6 = arith.constant 1.000000e+00 : f32
    %21 = vector.broadcast %cst_6 : f32 to vector<1x256xf32>
    %22 = arith.addf %18, %21 : vector<1x256xf32>
    %23 = arith.mulf %20, %22 : vector<1x256xf32>
    %24 = math.sqrt %23 : vector<1x256xf32>
    %25 = arith.addf %18, %24 : vector<1x256xf32>
    %26 = math.log %25 : vector<1x256xf32>
    %cst_7 = arith.constant 1.000000e+00 : f32
    %27 = vector.broadcast %cst_7 : f32 to vector<1x256xf32>
    %28 = arith.mulf %27, %26 : vector<1x256xf32>
    %29 = arith.mulf %28, %14 : vector<1x256xf32>
    %cst_8 = arith.constant 0.000000e+00 : f32
    %30 = vector.broadcast %cst_8 : f32 to vector<17x256xf32>
    %31 = arith.maximumf %8, %30 : vector<17x256xf32>
    %32 = arith.mulf %31, %31 : vector<17x256xf32>
    %cst_9 = arith.constant dense<0.000000e+00> : vector<256xf32>
    %33 = vector.multi_reduction <add>, %32, %cst_9 [0] : vector<17x256xf32> to vector<256xf32>
    %34 = vector.shape_cast %33 : vector<256xf32> to vector<1x256xf32>
    %cst_10 = arith.constant 1.000000e-30 : f32
    %35 = vector.broadcast %cst_10 : f32 to vector<1x256xf32>
    %36 = arith.maximumf %34, %35 : vector<1x256xf32>
    %37 = math.rsqrt %36 : vector<1x256xf32>
    %38 = arith.mulf %34, %37 : vector<1x256xf32>
    %39 = arith.mulf %29, %38 : vector<1x256xf32>
    %cst_11 = arith.constant 1.41421354 : f32
    %40 = vector.broadcast %cst_11 : f32 to vector<1x256xf32>
    %41 = arith.mulf %39, %40 : vector<1x256xf32>
    %42 = math.exp %41 : vector<1x256xf32>
    %cst_12 = arith.constant 0.000000e+00 : f32
    %43 = vector.broadcast %cst_12 : f32 to vector<1x256xf32>
    %44 = arith.subf %43, %41 : vector<1x256xf32>
    %45 = math.exp %44 : vector<1x256xf32>
    %46 = arith.addf %42, %45 : vector<1x256xf32>
    %cst_13 = arith.constant 5.000000e-01 : f32
    %47 = vector.broadcast %cst_13 : f32 to vector<1x256xf32>
    %48 = arith.mulf %47, %46 : vector<1x256xf32>
    %49 = arith.subf %42, %45 : vector<1x256xf32>
    %cst_14 = arith.constant 5.000000e-01 : f32
    %50 = vector.broadcast %cst_14 : f32 to vector<1x256xf32>
    %51 = arith.mulf %50, %49 : vector<1x256xf32>
    %cst_15 = arith.constant 0.707106769 : f32
    %52 = vector.broadcast %cst_15 : f32 to vector<1x256xf32>
    %53 = arith.mulf %52, %48 : vector<1x256xf32>
    %cst_16 = arith.constant 0.707106769 : f32
    %54 = vector.broadcast %cst_16 : f32 to vector<1x256xf32>
    %55 = arith.mulf %54, %51 : vector<1x256xf32>
    %56 = arith.mulf %55, %37 : vector<1x256xf32>
    %57 = vector.broadcast %56 : vector<1x256xf32> to vector<17x256xf32>
    %58 = arith.mulf %57, %31 : vector<17x256xf32>
    %c0_17 = arith.constant 0 : index
    %c0_18 = arith.constant 0 : index
    %59 = vector.load %arg2[%c0_17, %c0_18] : memref<17x256xf32, #tpu.memory_space<vmem>>, vector<17x256xf32>
    tpu.vector_store %arg2[%c0_17, %c0_18], %58 {strides = array<i32>} : memref<17x256xf32, #tpu.memory_space<vmem>>, vector<17x256xf32>,
    %c0_19 = arith.constant 0 : index
    %c0_20 = arith.constant 0 : index
    %60 = vector.load %arg2[%c0_19, %c0_20] : memref<17x256xf32, #tpu.memory_space<vmem>>, vector<1x256xf32>
    tpu.vector_store %arg2[%c0_19, %c0_20], %53 {strides = array<i32>} : memref<17x256xf32, #tpu.memory_space<vmem>>, vector<1x256xf32>,
    return
  }
  func.func @transform_0(%arg0: i32) -> (i32, i32) {
    %c0_i32 = arith.constant 0 : i32
    %c0_i32_0 = arith.constant 0 : i32
    return %c0_i32, %arg0 : i32, i32
  }
  func.func @transform_1(%arg0: i32) -> (i32, i32) {
    %c0_i32 = arith.constant 0 : i32
    %c0_i32_0 = arith.constant 0 : i32
    return %c0_i32, %arg0 : i32, i32
  }
}

</mosaic_0001>

<bundles_post_ra>
// kernel: tpu_custom_call.1
= control target key start
LH: loop header
LB: loop body
LE: loop exit
PB: predicated region body
PF: predicated region fallthrough
CT: control target
= control target key end

     0   :  { %6 = vsyncpa [#allocation3], 0  ;;  %s849_s0 = inlined_call_operand.hbm [shape: f32[17,512], index: 0, kind: input, shape index: {}]   ;;  %s850_s1 = inlined_call_operand.hbm [shape: f32[17,512], index: 1, kind: output, shape index: {}]  }
   0x1   :  { %8 = vsyncpa [#allocation3 + $0x1], 0 }
   0x2   :  { %9 = vsyncpa [#allocation4], 0 }
   0x3   :  { %11 = vsyncpa [#allocation4 + $0x1], 0  ;;  %s653_s6 = smov 0   ;;  %s655_s7 = smov 0  }
   0x4   :  { %s657_s8 = smov 0   ;;  %s659_s9 = smov 0  }
   0x5 LB: > { %s674_s10 = sadd.s32 4294967295, %s635_s9   ;;  %s447_s11 = sadd.s32 4294967294, %s635_s9   ;;  %s635_s9 = sphi %s659_s9, %s858_s9   ;;  %s631_s8 = sphi %s657_s8, %s857_s8   ;;  %s627_s7 = sphi %s655_s7, %s856_s7   ;;  %s623_s6 = sphi %s653_s6, %s855_s6  }
   0x6   : > { %s678_s12 = sadd.s32 1, %s635_s9   ;;  %s24_s13 = sadd.s32 1, %s631_s8 }
   0x7   : > { %s21_s14 = ssub.s32 %s635_s9, %s678_s12  ;;  %p31_p0 = scmp.ne.s32.totalorder %s631_s8, %s627_s7 }
   0x8   : > { %p22_p1 = scmp.eq.s32.totalorder %s21_s14, 0  ;;  %p32_p2 = scmp.eq.s32.totalorder %s635_s9, 0 }
   0x9   : > { %p37_p3 = scmp.ne.s32.totalorder %s627_s7, %s623_s6  ;;  %p38_p4 = scmp.eq.s32.totalorder %s674_s10, 0 }
   0xa   : > { %s690_s15 = scalar_select %p22_p1, %s631_s8, %s24_s13  }
   0xb   : > { %p33_p5 = por %p32_p2, %p31_p0  ;;  %p692_p6 = por %p38_p4, %p37_p3 }
   0xc   : > { %p61_p7 = scmp.eq.s32.totalorder %s674_s10, 1  ;;  %p67_p8 = scmp.eq.s32.totalorder %s447_s11, 1 }
   0xd   : > { %p449_p9 = scmp.ge.s32.totalorder %s635_s9, 2  ;;  %p475_p10 = scmp.lt.s32.totalorder %s635_s9, 2 }
   0xe   : > { %p699_p11 = por %p61_p7, %p31_p0  ;;  %p703_p12 = por %p67_p8, %p37_p3 }
   0xf   : > { %s87_s19 = sand.u32 1, %s631_s8   ;;  %s459_s20 = sshll.u32 %s635_s9, 4 }
  0x10   : > { %s461_s21 = smul.u32 48, %s87_s19  ;;  %s96_s24 = scalar_lea.hbm %s849_s0, %s459_s20 }
  0x11   : > { %p712_p13 = pnand %p475_p10, %p33_p5  ;;  %s97_s26 = sshll.u32 %s96_s24, 4  ;;  %s98_s26 = int_to_ptr.hbm [resolvable:$true] %s97_s26 }
  0x12   : > { %s91_s27 = scalar_lea.vmem [#allocation2], %s461_s21  ;;  %p452_p0 = scmp.ge.s32.totalorder %s635_s9, 1 }
  0x13   : > { %s99_s28 = sshll.u32 %s91_s27, 4  ;;  %s88_s29 = scalar_lea.sflag [#allocation3], %s87_s19  ;;  %s100_s28 = int_to_ptr.vmem [resolvable:$true] %s99_s28 }
  0x14   : > { %s539_s30 = sshra.s32 %s98_s26, 4  ;;  %p543_p2 = pneg %p712_p13  ;;  %s540_s30 = int_to_ptr.hbm [resolvable:$true] %s539_s30 }
  0x15   : > { %s541_s2 = scalar_lea.hbm %s540_s30, 48  ;;  %s546_s5 = scalar_lea.hbm %s849_s0, 96 }
  0x16   : > { %p542_p1 = scmp.ne.s32.totalorder %s540_s30, %s541_s2  ;;  %p547_p5 = scmp.lt.s32.totalorder %s540_s30, %s849_s0 }
  0x17   : > { %p548_p7 = scmp.lt.s32.totalorder %s546_s5, %s541_s2 }
  0x18   : > { %p544_p3 = pnand %p543_p2, %p542_p1 }
  0x19   : > { %p549_p8 = por %p548_p7, %p547_p5 }
  0x1a   : > { %p545_p4 = pneg %p544_p3 }
  0x1c   : > { %p550_p10 = pnand %p549_p8, %p545_p4 }
  0x1e   : > { %553 = shalt.err (!%p550_p10)
}
  0x1f   : > { %s637_s14 = smov 512   ;;  %s638_s19 = smov 256  }
  0x20   : > { %s639_s20 = smov 16   ;;  %p107_p1 = scmp.lt.s32.totalorder %s635_s9, 3 }
  0x21   : > { %470 = dma.hbm_to_vmem [thread:$0]  (!%p712_p13), %s98_s26, 768, %s100_s28, %s88_s29, %s637_s14, %s638_s19, %s639_s20  }
  0x22   : > { %p108_p2 = pnand %p452_p0, %p107_p1 }
  0x23   : > { %s731_s21 = sand.u32 (!%p108_p2), 1, %s627_s7  }
  0x24   : > { %111 = sbr.rel (%p108_p2) target bundleno = 128 (0x80), region = 24  ;;  %s114_s23 = scalar_lea.sflag (!%p108_p2), [#allocation3], %s731_s21 }
  0x25   : > { %s462_s22 = smul.u32 (!%p108_p2), 48, %s731_s21 }
  0x27   : > { %s117_s24 = scalar_lea.vmem (!%p108_p2), [#allocation2], %s462_s22 }
  0x29   : > { %614 = dma.done.wait (%p692_p6), %s114_s23, 768  }
  0x2a   : > { %616 = vsyncadd (%p692_p6), %s114_s23, 4294966528  ;;  %v145_v0 = vlaneseq  ;;  %v139_v2 = vld [vmem:[%s117_s24] sm:$0xff]  ;;  %v141_v3 = vld [vmem:[%s117_s24 + $0x10] sm:$0xff]  ;;  %vm171_vm1 = vcmask 1040384   ;;  %s136_s16 = scalar_lea.vmem [#allocation5], %s462_s22  ;;  %s460_s25 = sshll.u32 %s674_s10, 4 }
  0x2b   : > { %v143_v4 = vld [vmem:[%s117_s24 + $0x20] sm:$0x1]  ;;  %v166_v6 = vmul.f32 %v141_v3, %v141_v3  ;;  %v743_v8 = vmax.f32 %v139_v2, 1.0000001  ;;  %v140_v9 = vld [vmem:[%s117_s24 + $0x8] sm:$0xff]  ;;  %v747_v12 = vmax.f32 %v141_v3, 0.0  ;;  %s370_s28 = scalar_lea.hbm %s850_s1, %s460_s25 }
  0x2c   : > { %v146_v1 = vshrl.u32 %v145_v0, 7  ;;  %v168_v7 = vmul.f32 %v143_v4, %v143_v4  ;;  %v749_v13 = vmax.f32 %v143_v4, 0.0  ;;  %v142_v22 = vld [vmem:[%s117_s24 + $0x18] sm:$0xff]  ;;  %v144_v23 = vld [vmem:[%s117_s24 + $0x28] sm:$0x1]  ;;  %s371_s29 = sshll.u32 %s136_s16, 4  ;;  %s372_s29 = int_to_ptr.vmem [resolvable:$true] %s371_s29 }
  0x2d   : > { %v453_v15 = vadd.f32 -1.0, %v743_v8  ;;  %v215_v16 = vadd.f32 1.0, %v743_v8  ;;  %v259_v20 = vmul.f32 %v747_v12, %v747_v12  ;;  %v167_v26 = vmul.f32 %v142_v22, %v142_v22  ;;  %s373_s30 = sshll.u32 %s370_s28, 4  ;;  %s359_s10 = scalar_lea.sflag [#allocation4], %s731_s21  ;;  %s374_s30 = int_to_ptr.hbm [resolvable:$true] %s373_s30 }
  0x2e   : > { %vm149_vm0 = vcmp.gt.s32.totalorder %v146_v1, 0  ;;  %v172_v14 = vsel %vm171_vm1, %v168_v7, 0.0  ;;  %v261_v21 = vmul.f32 %v749_v13, %v749_v13  ;;  %v169_v27 = vmul.f32 %v144_v23, %v144_v23  ;;  %s583_s2 = sshra.s32 %s374_s30, 4  ;;  %s589_s11 = scalar_lea.hbm %s850_s1, 96  ;;  %s584_s2 = int_to_ptr.hbm [resolvable:$true] %s583_s2 }
  0x2f   : > { %v158_v5 = vsel %vm149_vm0, %v139_v2, 0.0  ;;  %v159_v17 = vsel %vm149_vm0, %v140_v9, 0.0  ;;  %v761_v24 = vmul.f32 %v453_v15, %v215_v16  ;;  %v764_v31 = vmax.f32 %v140_v9, 1.0000001  ;;  %s585_s3 = scalar_lea.hbm %s584_s2, 48  ;;  %p590_p3 = scmp.lt.s32.totalorder %s584_s2, %s850_s1 }
  0x30   : > { %v164_v10 = vmul.f32 %v158_v5, %v158_v5  ;;  %v745_v11 = vmax.f32 %v158_v5, 0.0  ;;  %v165_v25 = vmul.f32 %v159_v17, %v159_v17  ;;  %v264_v30 = vsel %vm171_vm1, %v261_v21, 0.0  ;;  %p586_p6 = scmp.ne.s32.totalorder %s584_s2, %s585_s3  ;;  %p591_p4 = scmp.lt.s32.totalorder %s589_s11, %s585_s3 }
  0x31   : > { %515 = vrsqrt.f32 %v761_v24  ;;  %v181_v35 = vsel %vm171_vm1, %v169_v27, 0.0  ;;  %v454_v36 = vadd.f32 -1.0, %v764_v31  ;;  %v216_v37 = vadd.f32 1.0, %v764_v31 }
  0x32   : > { %v170_v18 = vadd.f32 %v166_v6, %v164_v10  ;;  %v257_v19 = vmul.f32 %v745_v11, %v745_v11  ;;  %v180_v34 = vadd.f32 %v167_v26, %v165_v25  ;;  %v770_v38 = vmax.f32 %v159_v17, 0.0  ;;  %p587_p13 = pnand %p586_p6, %p699_p11  ;;  %p592_p5 = por %p591_p4, %p590_p3 }
  0x33   : > { %v772_v39 = vmax.f32 %v142_v22, 0.0  ;;  %v774_v43 = vmax.f32 %v144_v23, 0.0  ;;  %v776_v44 = vmul.f32 %v454_v36, %v216_v37  ;;  %vm226_vm2 = vcmp.eq.f32.partialorder %v761_v24, inf }
  0x34   : > { %v173_v28 = vadd.f32 %v172_v14, %v170_v18  ;;  %v263_v29 = vadd.f32 %v259_v20, %v257_v19  ;;  %v182_v42 = vadd.f32 %v181_v35, %v180_v34  ;;  %v258_v45 = vmul.f32 %v770_v38, %v770_v38  ;;  %p588_p0 = pneg %p587_p13 }
  0x35   : > { %v260_v46 = vmul.f32 %v772_v39, %v772_v39  ;;  %v262_v50 = vmul.f32 %v774_v43, %v774_v43  ;;  %517 = vrsqrt.f32 %v776_v44  ;;  %v229_v18 = vand.u32 2147483648, %v761_v24 }
  0x36   : > { %v174_v32 = vrot.slane %v173_v28, 4  ;;  %v265_v33 = vadd.f32 %v264_v30, %v263_v29  ;;  %v183_v49 = vrot.slane %v182_v42, 4  ;;  %vm228_vm3 = vcmp.eq.f32.partialorder %v761_v24, 0.0  ;;  %p593_p7 = pnand %p592_p5, %p588_p0 }
  0x37   : > { %v516_v51 = vpop.eup %515  ;;  %v272_v56 = vadd.f32 %v260_v46, %v258_v45  ;;  %v273_v57 = vsel %vm171_vm1, %v262_v50, 0.0  ;;  %vm238_vm4 = vcmp.eq.f32.partialorder %v776_v44, inf  ;;  %v241_v37 = vand.u32 2147483648, %v776_v44 }
  0x38   : > { %v175_v40 = vadd.f32 %v174_v32, %v173_v28  ;;  %v266_v41 = vrot.slane %v265_v33, 4  ;;  %v220_v53 = vmul.f32 %v516_v51, %v761_v24  ;;  %v184_v55 = vadd.f32 %v183_v49, %v182_v42 }
  0x39   : > { %v274_v62 = vadd.f32 %v273_v57, %v272_v56  ;;  %vm240_vm5 = vcmp.eq.f32.partialorder %v776_v44, 0.0 }
  0x3a   : > { %v176_v47 = vrot.slane %v175_v40, 2  ;;  %v267_v48 = vadd.f32 %v266_v41, %v265_v33  ;;  %v221_v59 = vmul.f32 %v516_v51, %v220_v53  ;;  %v185_v61 = vrot.slane %v184_v55, 2 }
  0x3b   : > { %v518_v4 = vpop.eup %517  ;;  %v275_v5 = vrot.slane %v274_v62, 4 }
  0x3c   : > { %v177_v52 = vadd.f32 %v176_v47, %v175_v40  ;;  %v268_v54 = vrot.slane %v267_v48, 2  ;;  %v222_v1 = vmul.f32 0.5, %v221_v59  ;;  %v186_v3 = vadd.f32 %v185_v61, %v184_v55 }
  0x3d   : > { %v232_v14 = vmul.f32 %v518_v4, %v776_v44  ;;  %v276_v15 = vadd.f32 %v275_v5, %v274_v62 }
  0x3e   : > { %v178_v58 = vrot.slane %v177_v52, 1  ;;  %v269_v60 = vadd.f32 %v268_v54, %v267_v48  ;;  %v223_v7 = vsub.f32 1.5, %v222_v1  ;;  %v187_v10 = vrot.slane %v186_v3, 1 }
  0x3f   : > { %v233_v20 = vmul.f32 %v518_v4, %v232_v14  ;;  %v277_v21 = vrot.slane %v276_v15, 2 }
  0x40   : > { %v179_v63 = vadd.f32 %v178_v58, %v177_v52  ;;  %v270_v2 = vrot.slane %v269_v60, 1  ;;  %v224_v16 = vmul.f32 %v516_v51, %v223_v7  ;;  %v188_v19 = vadd.f32 %v187_v10, %v186_v3 }
  0x41   : > { %v234_v25 = vmul.f32 0.5, %v233_v20  ;;  %v278_v26 = vadd.f32 %v277_v21, %v276_v15 }
  0x42   : > { %v189_v6 = vmax.f32 %v179_v63, 1e-30  ;;  %v787_v9 = vadd.f32 %v270_v2, %v269_v60  ;;  %v225_v22 = vmul.f32 %v224_v16, %v761_v24  ;;  %v190_v23 = vmax.f32 %v188_v19, 1e-30 }
  0x43   : > { %v235_v29 = vsub.f32 1.5, %v234_v25  ;;  %v279_v33 = vrot.slane %v278_v26, 1 }
  0x44   : > { %519 = vrsqrt.f32 %v189_v6  ;;  %v281_v17 = vmax.f32 %v787_v9, 1e-30  ;;  %v227_v27 = vsel %vm226_vm2, %v761_v24, %v225_v22  ;;  %vm197_vm6 = vweird.f32 %v189_v6 }
  0x45   : > { %v230_v28 = vsel %vm228_vm3, %v229_v18, %v227_v27  ;;  %v236_v35 = vmul.f32 %v518_v4, %v235_v29  ;;  %v280_v40 = vadd.f32 %v279_v33, %v278_v26  ;;  %vm207_vm12 = vweird.f32 %v190_v23 }
  0x46   : > { %521 = vrsqrt.f32 %v281_v17  ;;  %v243_v32 = vadd.f32 %v230_v28, %v743_v8  ;;  %vm289_vm8 = vweird.f32 %v281_v17  ;;  %vm354_vm3 = vcmp.lt.s32.totalorder %v145_v0, 256 }
  0x47   : > { %523 = vrsqrt.f32 %v190_v23  ;;  %v237_v24 = vmul.f32 %v236_v35, %v776_v44  ;;  %v282_v45 = vmax.f32 %v280_v40, 1e-30 }
  0x48   : > { %525 = vlog2.f32 %v243_v32 }
  0x49   : > { %v239_v48 = vsel %vm238_vm4, %v776_v44, %v237_v24  ;;  %527 = vrsqrt.f32 %v282_v45  ;;  %vm299_vm15 = vweird.f32 %v282_v45 }
  0x4a   : > { %v520_v30 = vpop.eup %519  ;;  %v242_v50 = vsel %vm240_vm5, %v241_v37, %v239_v48 }
  0x4b   : > { %v192_v34 = vmul.f32 %v520_v30, %v189_v6  ;;  %vm198_vm7 = vweird.f32 %v520_v30  ;;  %v244_v53 = vadd.f32 %v242_v50, %v764_v31 }
  0x4c   : > { %v522_v36 = vpop.eup %521  ;;  %vm199_vm10 = vmor %vm197_vm6, %vm198_vm7 }
  0x4d   : > { %v193_v41 = vmul.f32 %v520_v30, %v192_v34  ;;  %v284_v42 = vmul.f32 %v522_v36, %v281_v17  ;;  %v524_v46 = vpop.eup %523  ;;  %vm290_vm9 = vweird.f32 %v522_v36  ;;  %529 = vlog2.f32 %v244_v53 }
  0x4e   : > { %v202_v49 = vmul.f32 %v524_v46, %v190_v23  ;;  %v526_v54 = vpop.eup %525  ;;  %vm291_vm11 = vmor %vm289_vm8, %vm290_vm9  ;;  %vm208_vm13 = vweird.f32 %v524_v46 }
  0x4f   : > { %v194_v8 = vmul.f32 0.5, %v193_v41  ;;  %v285_v47 = vmul.f32 %v522_v36, %v284_v42  ;;  %v246_v57 = vmul.f32 0.6931472, %v526_v54  ;;  %v528_v61 = vpop.eup %527  ;;  %vm209_vm14 = vmor %vm207_vm12, %vm208_vm13 }
  0x50   : > { %v203_v55 = vmul.f32 %v524_v46, %v202_v49  ;;  %v294_v31 = vmul.f32 %v528_v61, %v282_v45  ;;  %vm300_vm0 = vweird.f32 %v528_v61 }
  0x51   : > { %v195_v51 = vsub.f32 1.5, %v194_v8  ;;  %v286_v52 = vmul.f32 0.5, %v285_v47  ;;  %vm301_vm2 = vmor %vm299_vm15, %vm300_vm0 }
  0x52   : > { %v204_v44 = vmul.f32 0.5, %v203_v55  ;;  %v295_v5 = vmul.f32 %v528_v61, %v294_v31 }
  0x53   : > { %v196_v56 = vmul.f32 %v520_v30, %v195_v51  ;;  %v287_v58 = vsub.f32 1.5, %v286_v52  ;;  %v530_v3 = vpop.eup %529 }
  0x54   : > { %v205_v63 = vsub.f32 1.5, %v204_v44  ;;  %v296_v7 = vmul.f32 0.5, %v295_v5  ;;  %v248_v14 = vmul.f32 0.6931472, %v530_v3 }
  0x55   : > { %v200_v59 = vsel %vm199_vm10, %v520_v30, %v196_v56  ;;  %v288_v60 = vmul.f32 %v522_v36, %v287_v58 }
  0x56   : > { %v249_v62 = vmul.f32 %v246_v57, %v200_v59  ;;  %v206_v4 = vmul.f32 %v524_v46, %v205_v63  ;;  %v297_v16 = vsub.f32 1.5, %v296_v7 }
  0x57   : > { %v292_v1 = vsel %vm291_vm11, %v522_v36, %v288_v60 }
  0x58   : > { %v303_v2 = vmul.f32 %v292_v1, %v787_v9  ;;  %v210_v15 = vsel %vm209_vm14, %v524_v46, %v206_v4  ;;  %v298_v19 = vmul.f32 %v528_v61, %v297_v16 }
  0x59   : > { %v250_v21 = vmul.f32 %v248_v14, %v210_v15 }
  0x5a   : > { %v305_v6 = vmul.f32 %v303_v2, %v249_v62  ;;  %v302_v9 = vsel %vm301_vm2, %v528_v61, %v298_v19 }
  0x5b   : > { %v304_v22 = vmul.f32 %v302_v9, %v280_v40 }
  0x5c   : > { %v307_v10 = vmul.f32 1.4142135, %v305_v6 }
  0x5d   : > { %v306_v23 = vmul.f32 %v304_v22, %v250_v21 }
  0x5e   : > { %v309_v17 = vmul.f32 1.442695, %v307_v10  ;;  %v313_v18 = vsub.f32 0.0, %v307_v10 }
  0x5f   : > { %v308_v26 = vmul.f32 1.4142135, %v306_v23 }
  0x60   : > { %531 = vpow2.f32 %v309_v17  ;;  %v315_v20 = vmul.f32 1.442695, %v313_v18 }
  0x61   : > { %v311_v28 = vmul.f32 1.442695, %v308_v26  ;;  %v314_v29 = vsub.f32 0.0, %v308_v26 }
  0x62   : > { %533 = vpow2.f32 %v315_v20 }
  0x63   : > { %535 = vpow2.f32 %v311_v28  ;;  %v317_v32 = vmul.f32 1.442695, %v314_v29 }
  0x65   : > { %537 = vpow2.f32 %v317_v32 }
  0x66   : > { %v532_v25 = vpop.eup %531 }
  0x68   : > { %v534_v27 = vpop.eup %533 }
  0x69   : > { %v323_v30 = vsub.f32 %v532_v25, %v534_v27  ;;  %v536_v36 = vpop.eup %535  ;;  %v319_v42 = vadd.f32 %v534_v27, %v532_v25 }
  0x6b   : > { %v325_v33 = vmul.f32 0.5, %v323_v30  ;;  %v538_v41 = vpop.eup %537  ;;  %v321_v50 = vmul.f32 0.5, %v319_v42 }
  0x6c   : > { %v324_v24 = vsub.f32 %v536_v36, %v538_v41  ;;  %v320_v8 = vadd.f32 %v538_v41, %v536_v36 }
  0x6d   : > { %v329_v34 = vmul.f32 0.70710677, %v325_v33 }
  0x6e   : > { %v326_v47 = vmul.f32 0.5, %v324_v24  ;;  %v322_v48 = vmul.f32 0.5, %v320_v8 }
  0x6f   : > { %v331_v35 = vmul.f32 %v329_v34, %v292_v1 }
  0x70   : > { %v330_v49 = vmul.f32 0.70710677, %v326_v47  ;;  %v328_v51 = vmul.f32 0.70710677, %v322_v48 }
  0x71   : > { %v333_v37 = vperm.slane %v331_v35, 0 }
  0x72   : > { %v332_v52 = vmul.f32 %v330_v49, %v302_v9 }
  0x73   : > { %v335_v40 = vmul.f32 %v333_v37, %v745_v11  ;;  %v337_v45 = vmul.f32 %v333_v37, %v747_v12  ;;  %v339_v46 = vmul.f32 %v333_v37, %v749_v13  ;;  %v327_v12 = vmul.f32 0.70710677, %v321_v50 }
  0x74   : > { %v334_v11 = vperm.slane %v332_v52, 0  ;;  %v349_v13 = vrot.slane %v328_v51, 7 }
  0x75   : > { %341 = vst [vmem:[%s136_s16] sm:$0xff] %v335_v40 }
  0x76   : > { %343 = vst [vmem:[%s136_s16 + $0x10] sm:$0xff] %v337_v45  ;;  %v336_v53 = vmul.f32 %v334_v11, %v770_v38  ;;  %v338_v54 = vmul.f32 %v334_v11, %v772_v39  ;;  %v340_v55 = vmul.f32 %v334_v11, %v774_v43  ;;  %v350_v56 = vsel %vm171_vm1, %v327_v12, %v349_v13 }
  0x77   : > { %345 = vst [vmem:[%s136_s16 + $0x20] sm:$0x1] %v339_v46 }
  0x78   : > { %342 = vst [vmem:[%s136_s16 + $0x8] sm:$0xff] %v336_v53 }
  0x79   : > { %344 = vst [vmem:[%s136_s16 + $0x18] sm:$0xff] %v338_v54 }
  0x7a   : > { %346 = vst [vmem:[%s136_s16 + $0x28] sm:$0x1] %v340_v55 }
  0x7b   : > { %356 = vst.msk [vmem:[%s136_s16] ss:$8 sm:$0x3] %vm354_vm3, %v350_v56 }
  0x7c   : > { %596 = shalt.err (!%p593_p7)
}
  0x7d   : > { %s640_s19 = smov 256   ;;  %s641_s20 = smov 512  }
  0x7e   : > { %s642_s21 = smov 16  }
  0x7f   : > { %465 = dma.vmem_to_hbm [thread:$0]  (%p699_p11), %s372_s29, 768, %s374_s30, %s359_s10, %s640_s19, %s641_s20, %s642_s21  }
  0x80 PF: > { %s388_s22 = sand.u32 1, %s623_s6   ;;  %p472_p8 = pnand %p449_p9, %p703_p12 }
  0x81   : > { %s389_s23 = scalar_lea.sflag [#allocation4], %s388_s22 }
  0x82   : > { %p473_p10 = pneg %p472_p8 }
  0x84   : > { %618 = dma.done.wait (%p473_p10), %s389_s23, 768  }
  0x85   : > { %620 = vsyncadd (%p473_p10), %s389_s23, 4294966528  ;;  %p14_p1 = scmp.ge.s32.totalorder %s678_s12, 4   ;;  %s855_s6 = smov %s627_s7 }
  0x86   : > { %s856_s7 = smov %s631_s8  ;;  %s857_s8 = smov %s690_s15 }
  0x87   : > { %s858_s9 = smov %s678_s12  ;;  %16 = sbr.rel (!%p14_p1) target bundleno = 5 (0x5), region = 69 }
  0x8c   :  { %395 = vsyncpa [#allocation3], 1 }
  0x8d   :  { %397 = vsyncpa [#allocation3 + $0x1], 1 }
  0x8e   :  { %398 = vsyncpa [#allocation4], 1 }
  0x8f   :  { %400 = vsyncpa [#allocation4 + $0x1], 1 }

</bundles_post_ra>
